<compile_context>
chip_gen: v5e
topology: v5e:2x2
jax: 0.10.0
libtpu: 0.0.40
codegen_flags: <defaults>
</compile_context>

<pallas_src>
import functools

import jax
import jax.numpy as jnp
from jax.experimental import pallas as pl
from jax.experimental.pallas import tpu as pltpu


def _qlinear_kernel(x_ref, wq_ref, s_ref, b_ref, o_ref, *maybe_acc,
                    groups_per_block, group_size):
    """One grid step: one (tm, tn) output tile x one K-block of `groups_per_block` groups.

    x_ref  : (tm, block_k)            activation K-block (block_k = gpb * group_size)
    wq_ref : (block_k, tn) int8       pre-transposed quantized weight K-block
    s_ref  : (num_groups, tn) f32     per-(group, out-channel) scales (N-tiled only)
    b_ref  : (1, tn) f32              bias N-tile
    o_ref  : (tm, tn)                 output tile (resident across the K axis)
    acc    : optional (tm, tn) f32 VMEM scratch (only when o_ref is not f32)
    """
    acc_ref = maybe_acc[0] if maybe_acc else o_ref   # f32 output: accumulate in place
    k = pl.program_id(2)

    @pl.when(k == 0)
    def _():
        acc_ref[...] = jnp.zeros_like(acc_ref)

    acc = acc_ref[...]
    base = k * groups_per_block
    # Static unroll over the quantization sub-groups in this K block.
    for g in range(groups_per_block):
        lo = g * group_size
        xg = x_ref[:, lo:lo + group_size].astype(jnp.bfloat16)      # (tm, gs)
        wg = wq_ref[lo:lo + group_size, :].astype(jnp.bfloat16)     # (gs, tn) exact int8->bf16
        partial = jnp.dot(xg, wg, preferred_element_type=jnp.float32)
        scale = s_ref[base + g, :]                                  # (tn,) f32
        acc = acc + partial * scale[None, :]
    acc_ref[...] = acc

    @pl.when(k == pl.num_programs(2) - 1)
    def _():
        o_ref[...] = (acc_ref[...] + b_ref[...]).astype(o_ref.dtype)


def _pick_tile(total, candidates):
    for c in candidates:
        if c <= total and total % c == 0:
            return c
    return total


def prepare_qlinear_params(qweight, scales, bias):
    """One-time preprocessing of the static quantized parameters.

    qweight: (N, K) int8  -> (K, N) int8  (lane-dense along out_features)
    scales : (N, num_groups) fp16/fp32 -> (num_groups, N) f32
    bias   : (N,) or None -> (1, N) f32
    """
    N, _ = qweight.shape
    wq_t = jnp.transpose(qweight)                              # (K, N) int8
    scales_t = jnp.transpose(scales).astype(jnp.float32)       # (num_groups, N)
    if bias is None:
        bias = jnp.zeros((N,), jnp.float32)
    bias2d = bias.astype(jnp.float32).reshape(1, N)            # (1, N)
    return wq_t, scales_t, bias2d


def quantized_linear(x, wq_t, scales_t, bias2d, group_size):
    """x: (..., K); wq_t: (K, N) int8; scales_t: (num_groups, N) f32; bias2d: (1, N) f32."""
    orig_shape = x.shape
    K = orig_shape[-1]
    x2 = x.reshape(-1, K)
    M = x2.shape[0]
    Kw, N = wq_t.shape
    assert Kw == K
    num_groups = scales_t.shape[0]
    assert scales_t.shape[1] == N
    # TODO(synk): ragged last group (K % group_size != 0) not implemented.
    assert K == num_groups * group_size

    # Tile selection (conservative: fits v5e/v6e/v7x default scoped VMEM).
    tm = _pick_tile(M, (256, 128, 64, 32, 16, 8))
    tn = _pick_tile(N, (512, 256, 128))
    # Batch several quantization groups per grid step so block_k ~ 256-512.
    gpb = 1
    for cand in range(min(num_groups, max(1, 512 // group_size)), 0, -1):
        if num_groups % cand == 0:
            gpb = cand
            break
    block_k = gpb * group_size

    grid = (M // tm, N // tn, num_groups // gpb)

    out_dtype = x2.dtype
    use_scratch = (out_dtype != jnp.float32)
    scratch = [pltpu.VMEM((tm, tn), jnp.float32)] if use_scratch else []

    kernel = functools.partial(
        _qlinear_kernel, groups_per_block=gpb, group_size=group_size)

    out = pl.pallas_call(
        kernel,
        out_shape=jax.ShapeDtypeStruct((M, N), out_dtype),
        grid_spec=pltpu.PrefetchScalarGridSpec(
            num_scalar_prefetch=0,
            grid=grid,
            in_specs=[
                pl.BlockSpec((tm, block_k), lambda i, j, k: (i, k)),      # x K-block
                pl.BlockSpec((block_k, tn), lambda i, j, k: (k, j)),      # int8 weight
                pl.BlockSpec((num_groups, tn), lambda i, j, k: (0, j)),   # scales (N-tiled)
                pl.BlockSpec((1, tn), lambda i, j, k: (0, j)),            # bias (N-tiled)
            ],
            out_specs=pl.BlockSpec((tm, tn), lambda i, j, k: (i, j)),
            scratch_shapes=scratch,
        ),
        compiler_params=pltpu.CompilerParams(
            dimension_semantics=("parallel", "parallel", "arbitrary")),
    )(x2, wq_t, scales_t, bias2d)

    return out.reshape(orig_shape[:-1] + (N,))


if __name__ == "__main__":
    # Small, module-consistent shapes: batch=8, in_features=256, out_features=128,
    # group_size=128 -> num_groups=2  (bits=8, symmetric=True, bias=True).
    M, K, N, GS = 8, 256, 128, 128

    key = jax.random.PRNGKey(0)
    kx, kw, ks, kb = jax.random.split(key, 4)

    x = jax.random.normal(kx, (M, K), dtype=jnp.float32)
    # Deterministic synthetic "quantized" parameters (no checkpoint load).
    qweight = jax.random.randint(kw, (N, K), minval=-127, maxval=128,
                                 dtype=jnp.int32).astype(jnp.int8)
    # The module stores scales / bias as fp16; simulate that storage precision.
    scales = (jax.random.uniform(ks, (N, K // GS), dtype=jnp.float32) * 0.01 + 0.005
              ).astype(jnp.float16)
    bias = (jax.random.normal(kb, (N,), dtype=jnp.float32) * 0.1).astype(jnp.float16)

    # One-time static-parameter prep (weight transpose hoisted out of the call path).
    wq_t, scales_t, bias2d = prepare_qlinear_params(qweight, scales, bias)

    # --- f32 input path (accumulates directly into the resident f32 output tile) ---
    out = quantized_linear(x, wq_t, scales_t, bias2d, GS)
    out = jax.block_until_ready(out)

    # Plain-JAX reference mirroring the kernel's operand precision (bf16 MXU
    # operands, f32 accumulation, f32 per-group scale + bias), group by group
    # exactly like the torch forward loop.
    scales_f32 = scales.astype(jnp.float32)
    bias_f32 = bias.astype(jnp.float32)
    x_bf = x.astype(jnp.bfloat16).astype(jnp.float32)
    num_groups = K // GS
    ref = jnp.zeros((M, N), jnp.float32)
    for g in range(num_groups):
        xg = x_bf[:, g * GS:(g + 1) * GS]
        wg = qweight[:, g * GS:(g + 1) * GS].astype(jnp.float32)       # (N, GS)
        partial = jax.lax.dot_general(xg, wg, (((1,), (1,)), ((), ())),
                                      precision=jax.lax.Precision.HIGHEST)
        ref = ref + partial * scales_f32[:, g][None, :]
    ref = ref + bias_f32[None, :]

    assert out.shape == (M, N)
    assert jnp.allclose(out, ref, rtol=2e-3, atol=2e-3), "f32-path mismatch vs reference"

    # --- bf16 input path (exercises the f32 VMEM scratch-accumulator variant) ---
    out_bf16 = quantized_linear(x.astype(jnp.bfloat16), wq_t, scales_t, bias2d, GS)
    out_bf16 = jax.block_until_ready(out_bf16)
    assert out_bf16.dtype == jnp.bfloat16
    assert jnp.allclose(out_bf16.astype(jnp.float32), ref, rtol=2e-2, atol=5e-2), \
        "bf16-path mismatch vs reference"

    print("KERNEL_OK")
</pallas_src>

<mosaic_0001>
module attributes {stable_mosaic.version = 11 : i64} {
  func.func @_qlinear_kernel(%arg0: i32, %arg1: i32, %arg2: i32, %arg3: memref<8x256xf32, #tpu.memory_space<vmem>>, %arg4: memref<256x128xi8, #tpu.memory_space<vmem>>, %arg5: memref<2x128xf32, #tpu.memory_space<vmem>>, %arg6: memref<1x128xf32, #tpu.memory_space<vmem>>, %arg7: memref<8x128xf32, #tpu.memory_space<vmem>>) attributes {dimension_semantics = [#tpu.dimension_semantics<parallel>, #tpu.dimension_semantics<parallel>, #tpu.dimension_semantics<arbitrary>], iteration_bounds = array<i64: 1, 1, 1>, scalar_prefetch = 0 : i64, scratch_operands = 0 : i64, tpu.core_type = #tpu.core_type<tc>, window_params = [{transform_indices = @transform_0, window_bounds = array<i64: 8, 256>}, {transform_indices = @transform_1, window_bounds = array<i64: 256, 128>}, {transform_indices = @transform_2, window_bounds = array<i64: 2, 128>}, {transform_indices = @transform_3, window_bounds = array<i64: 1, 128>}, {transform_indices = @transform_4, window_bounds = array<i64: 8, 128>}]} {
    %c0_i32 = arith.constant 0 : i32
    %0 = arith.cmpi eq, %arg2, %c0_i32 : i32
    %1 = arith.extui %0 : i1 to i32
    %c0_i32_0 = arith.constant 0 : i32
    %2 = arith.cmpi ne, %1, %c0_i32_0 : i32
    scf.if %2 {
      %cst_17 = arith.constant 0.000000e+00 : f32
      %35 = vector.broadcast %cst_17 : f32 to vector<8x128xf32>
      %c0_18 = arith.constant 0 : index
      %c0_19 = arith.constant 0 : index
      %36 = vector.load %arg7[%c0_18, %c0_19] : memref<8x128xf32, #tpu.memory_space<vmem>>, vector<8x128xf32>
      tpu.vector_store %arg7[%c0_18, %c0_19], %35 {strides = array<i32>} : memref<8x128xf32, #tpu.memory_space<vmem>>, vector<8x128xf32>,
    } else {
    }
    %c0 = arith.constant 0 : index
    %c0_1 = arith.constant 0 : index
    %3 = vector.load %arg7[%c0, %c0_1] : memref<8x128xf32, #tpu.memory_space<vmem>>, vector<8x128xf32>
    %c2_i32 = arith.constant 2 : i32
    %4 = arith.muli %arg2, %c2_i32 : i32
    %c0_2 = arith.constant 0 : index
    %c0_3 = arith.constant 0 : index
    %5 = vector.load %arg3[%c0_2, %c0_3] : memref<8x256xf32, #tpu.memory_space<vmem>>, vector<8x128xf32>
    %6 = arith.truncf %5 : vector<8x128xf32> to vector<8x128xbf16>
    %c0_4 = arith.constant 0 : index
    %c0_5 = arith.constant 0 : index
    %7 = vector.load %arg4[%c0_4, %c0_5] : memref<256x128xi8, #tpu.memory_space<vmem>>, vector<128x128xi8>
    %8 = arith.sitofp %7 : vector<128x128xi8> to vector<128x128xbf16>
    %cst = arith.constant dense<0.000000e+00> : vector<8x128xf32>
    %9 = tpu.matmul %6, %8, %cst {dimension_numbers = #tpu.dot_dimension_numbers<[1], [0], [0], [1], [0, 0, 1, 1], [], []>} : vector<8x128xbf16>, vector<128x128xbf16>, vector<8x128xf32> -> vector<8x128xf32>
    %c0_i32_6 = arith.constant 0 : i32
    %10 = arith.addi %4, %c0_i32_6 : i32
    %11 = arith.index_cast %10 : i32 to index
    %c0_7 = arith.constant 0 : index
    %12 = vector.load %arg5[%11, %c0_7] : memref<2x128xf32, #tpu.memory_space<vmem>>, vector<1x128xf32>
    %13 = vector.shape_cast %12 : vector<1x128xf32> to vector<128xf32>
    %14 = vector.shape_cast %13 : vector<128xf32> to vector<1x128xf32>
    %15 = vector.broadcast %14 : vector<1x128xf32> to vector<8x128xf32>
    %16 = arith.mulf %9, %15 : vector<8x128xf32>
    %17 = arith.addf %3, %16 : vector<8x128xf32>
    %c0_8 = arith.constant 0 : index
    %c128 = arith.constant 128 : index
    %18 = vector.load %arg3[%c0_8, %c128] : memref<8x256xf32, #tpu.memory_space<vmem>>, vector<8x128xf32>
    %19 = arith.truncf %18 : vector<8x128xf32> to vector<8x128xbf16>
    %c128_9 = arith.constant 128 : index
    %c0_10 = arith.constant 0 : index
    %20 = vector.load %arg4[%c128_9, %c0_10] : memref<256x128xi8, #tpu.memory_space<vmem>>, vector<128x128xi8>
    %21 = arith.sitofp %20 : vector<128x128xi8> to vector<128x128xbf16>
    %cst_11 = arith.constant dense<0.000000e+00> : vector<8x128xf32>
    %22 = tpu.matmul %19, %21, %cst_11 {dimension_numbers = #tpu.dot_dimension_numbers<[1], [0], [0], [1], [0, 0, 1, 1], [], []>} : vector<8x128xbf16>, vector<128x128xbf16>, vector<8x128xf32> -> vector<8x128xf32>
    %c1_i32 = arith.constant 1 : i32
    %23 = arith.addi %4, %c1_i32 : i32
    %24 = arith.index_cast %23 : i32 to index
    %c0_12 = arith.constant 0 : index
    %25 = vector.load %arg5[%24, %c0_12] : memref<2x128xf32, #tpu.memory_space<vmem>>, vector<1x128xf32>
    %26 = vector.shape_cast %25 : vector<1x128xf32> to vector<128xf32>
    %27 = vector.shape_cast %26 : vector<128xf32> to vector<1x128xf32>
    %28 = vector.broadcast %27 : vector<1x128xf32> to vector<8x128xf32>
    %29 = arith.mulf %22, %28 : vector<8x128xf32>
    %30 = arith.addf %17, %29 : vector<8x128xf32>
    %c0_13 = arith.constant 0 : index
    %c0_14 = arith.constant 0 : index
    %31 = vector.load %arg7[%c0_13, %c0_14] : memref<8x128xf32, #tpu.memory_space<vmem>>, vector<8x128xf32>
    tpu.vector_store %arg7[%c0_13, %c0_14], %30 {strides = array<i32>} : memref<8x128xf32, #tpu.memory_space<vmem>>, vector<8x128xf32>,
    %c0_i32_15 = arith.constant 0 : i32
    %32 = arith.cmpi eq, %arg2, %c0_i32_15 : i32
    %33 = arith.extui %32 : i1 to i32
    %c0_i32_16 = arith.constant 0 : i32
    %34 = arith.cmpi ne, %33, %c0_i32_16 : i32
    scf.if %34 {
      %c0_17 = arith.constant 0 : index
      %c0_18 = arith.constant 0 : index
      %35 = vector.load %arg7[%c0_17, %c0_18] : memref<8x128xf32, #tpu.memory_space<vmem>>, vector<8x128xf32>
      %c0_19 = arith.constant 0 : index
      %c0_20 = arith.constant 0 : index
      %36 = vector.load %arg6[%c0_19, %c0_20] : memref<1x128xf32, #tpu.memory_space<vmem>>, vector<1x128xf32>
      %37 = vector.broadcast %36 : vector<1x128xf32> to vector<8x128xf32>
      %38 = arith.addf %35, %37 : vector<8x128xf32>
      %c0_21 = arith.constant 0 : index
      %c0_22 = arith.constant 0 : index
      %39 = vector.load %arg7[%c0_21, %c0_22] : memref<8x128xf32, #tpu.memory_space<vmem>>, vector<8x128xf32>
      tpu.vector_store %arg7[%c0_21, %c0_22], %38 {strides = array<i32>} : memref<8x128xf32, #tpu.memory_space<vmem>>, vector<8x128xf32>,
    } else {
    }
    return
  }
  func.func @transform_0(%arg0: i32, %arg1: i32, %arg2: i32) -> (i32, i32) {
    %c0_i32 = arith.constant 0 : i32
    return %arg0, %arg2 : i32, i32
  }
  func.func @transform_1(%arg0: i32, %arg1: i32, %arg2: i32) -> (i32, i32) {
    %c0_i32 = arith.constant 0 : i32
    return %arg2, %arg1 : i32, i32
  }
  func.func @transform_2(%arg0: i32, %arg1: i32, %arg2: i32) -> (i32, i32) {
    %c0_i32 = arith.constant 0 : i32
    %c0_i32_0 = arith.constant 0 : i32
    return %c0_i32, %arg1 : i32, i32
  }
  func.func @transform_3(%arg0: i32, %arg1: i32, %arg2: i32) -> (i32, i32) {
    %c0_i32 = arith.constant 0 : i32
    %c0_i32_0 = arith.constant 0 : i32
    return %c0_i32, %arg1 : i32, i32
  }
  func.func @transform_4(%arg0: i32, %arg1: i32, %arg2: i32) -> (i32, i32) {
    %c0_i32 = arith.constant 0 : i32
    return %arg0, %arg1 : i32, i32
  }
}

</mosaic_0001>

<bundles_post_ra>
// kernel: tpu_custom_call.1
= control target key start
LH: loop header
LB: loop body
LE: loop exit
PB: predicated region body
PF: predicated region fallthrough
CT: control target
= control target key end

     0   :  { %9 = vsyncpa [#allocation3], 0  ;;  %s385_s0 = inlined_call_operand.hbm [shape: f32[8,256], index: 0, kind: input, shape index: {}]   ;;  %s386_s1 = inlined_call_operand.hbm [shape: s8[256,128], index: 1, kind: input, shape index: {}]   ;;  %s387_s2 = inlined_call_operand.hbm [shape: f32[2,128], index: 2, kind: input, shape index: {}]   ;;  %s388_s3 = inlined_call_operand.vmem [shape: f32[1,128], index: 3, kind: input, shape index: {}]   ;;  %s389_s4 = inlined_call_operand.hbm [shape: f32[8,128], index: 4, kind: output, shape index: {}]  }
   0x1   :  { %10 = vsyncpa [#allocation6], 0  ;;  %s27_s17 = sshll.u32 %s386_s1, 4  ;;  %s28_s17 = int_to_ptr.hbm [resolvable:$true] %s27_s17 }
   0x2   :  { %11 = vsyncpa [#allocation4], 0  ;;  %s339_s18 = smov [#allocation5]   ;;  %s17_s22 = sshll.u32 %s385_s0, 4  ;;  %s18_s22 = int_to_ptr.hbm [resolvable:$true] %s17_s22 }
   0x3   :  { %s29_s19 = sshll.u32 %s339_s18, 4  ;;  %s340_s23 = smov 128   ;;  %s30_s19 = int_to_ptr.vmem [resolvable:$true] %s29_s19 }
   0x4   :  { %s341_s24 = smov 8   ;;  %s342_s25 = smov [#allocation2]  }
   0x5   :  { %35 = dma.hbm_to_vmem [thread:$0]  %s28_s17, 1024, %s30_s19, [#allocation6], %s340_s23, %s340_s23, %s341_s24  }
   0x6   :  { %s19_s26 = sshll.u32 %s342_s25, 4  ;;  %s41_s29 = sshll.u32 %s387_s2, 4  ;;  %s20_s26 = int_to_ptr.vmem [resolvable:$true] %s19_s26  ;;  %s42_s29 = int_to_ptr.hbm [resolvable:$true] %s41_s29 }
   0x7   :  { %22 = dma.hbm_to_vmem [thread:$0]  %s18_s22, 256, %s20_s26, [#allocation3]  }
   0x8   :  { %s343_s1 = smov [#allocation7]  }
   0x9   :  { %s43_s30 = sshll.u32 %s343_s1, 4  ;;  %s44_s30 = int_to_ptr.vmem [resolvable:$true] %s43_s30 }
   0xa   :  { %46 = dma.hbm_to_vmem [thread:$0]  %s42_s29, 32, %s44_s30, [#allocation6]  }
   0xb   :  { %333 = dma.done.wait [#allocation3], 256  }
   0xc   :  { %334 = vsyncadd [#allocation3], 4294967040 }
   0xd   :  { %335 = dma.done.wait [#allocation6], 1056  }
   0xe   :  { %336 = vsyncadd [#allocation6], 4294966240  ;;  %v73_v0 = vld [vmem:[#allocation5 + $0x18] sm:$0xff]  ;;  %v72_v10 = vld [vmem:[#allocation5 + $0x10] sm:$0xff]  ;;  %s344_s5 = smov [#allocation8]   ;;  %s215_s9 = sshll.u32 %s389_s4, 4  ;;  %s216_s9 = int_to_ptr.hbm [resolvable:$true] %s215_s9 }
   0xf   :  { %v137_v1 = vld [vmem:[#allocation5 + $0x38] sm:$0xff]  ;;  %v88_v2 = vunpack.c.2.s8 %v73_v0  ;;  %v89_v3 = vunpack.c.3.s8 %v73_v0  ;;  %v86_v6 = vunpack.c.0.s8 %v73_v0  ;;  %v87_v7 = vunpack.c.1.s8 %v73_v0  ;;  %v136_v15 = vld [vmem:[#allocation5 + $0x30] sm:$0xff]  ;;  %v71_v32 = vld [vmem:[#allocation5 + $0x8] sm:$0xff]  ;;  %s213_s6 = sshll.u32 %s344_s5, 4  ;;  %s214_s6 = int_to_ptr.vmem [resolvable:$true] %s213_s6 }
  0x10   :  { %v152_v4 = vunpack.c.2.s8 %v137_v1  ;;  %v153_v5 = vunpack.c.3.s8 %v137_v1  ;;  %v150_v8 = vunpack.c.0.s8 %v137_v1  ;;  %v151_v9 = vunpack.c.1.s8 %v137_v1  ;;  %v135_v37 = vld [vmem:[#allocation5 + $0x28] sm:$0xff]  ;;  %v70_v54 = vld [vmem:[#allocation5] sm:$0xff] }
  0x11   :  { %v104_v11 = vcvt.s32.f32 %v88_v2  ;;  %v105_v12 = vcvt.s32.f32 %v89_v3  ;;  %v102_v16 = vcvt.s32.f32 %v86_v6  ;;  %v103_v17 = vcvt.s32.f32 %v87_v7  ;;  %v134_v59 = vld [vmem:[#allocation5 + $0x20] sm:$0xff] }
  0x12   :  { %v168_v13 = vcvt.s32.f32 %v152_v4  ;;  %v169_v14 = vcvt.s32.f32 %v153_v5  ;;  %v166_v18 = vcvt.s32.f32 %v150_v8  ;;  %v167_v19 = vcvt.s32.f32 %v151_v9 }
  0x13   :  { %v113_v20 = vpack.c.bf16 %v105_v12, %v104_v11  ;;  %v84_v22 = vunpack.c.2.s8 %v72_v10  ;;  %v85_v23 = vunpack.c.3.s8 %v72_v10  ;;  %v112_v24 = vpack.c.bf16 %v103_v17, %v102_v16 }
  0x14   :  { %v177_v21 = vpack.c.bf16 %v169_v14, %v168_v13  ;;  %v176_v25 = vpack.c.bf16 %v167_v19, %v166_v18  ;;  %v148_v26 = vunpack.c.2.s8 %v136_v15  ;;  %v149_v27 = vunpack.c.3.s8 %v136_v15 }
  0x15   :  { %114 = vmatpush.bf16.msra.mxu0 %v113_v20  ;;  %v100_v28 = vcvt.s32.f32 %v84_v22  ;;  %v101_v29 = vcvt.s32.f32 %v85_v23  ;;  %v82_v30 = vunpack.c.0.s8 %v72_v10  ;;  %v83_v31 = vunpack.c.1.s8 %v72_v10 }
  0x16   :  { %178 = vmatpush.bf16.msra.mxu1 %v177_v21  ;;  %v164_v33 = vcvt.s32.f32 %v148_v26  ;;  %v165_v34 = vcvt.s32.f32 %v149_v27  ;;  %v146_v35 = vunpack.c.0.s8 %v136_v15  ;;  %v147_v36 = vunpack.c.1.s8 %v136_v15 }
  0x17   :  { %v111_v38 = vpack.c.bf16 %v101_v29, %v100_v28  ;;  %v98_v39 = vcvt.s32.f32 %v82_v30  ;;  %v99_v41 = vcvt.s32.f32 %v83_v31  ;;  %v80_v43 = vunpack.c.2.s8 %v71_v32  ;;  %v234_v28 = vld [vmem:[#allocation7] ss:$0 sm:$0xff]  ;;  %v235_v29 = vld [vmem:[#allocation7 + $0x1] ss:$0 sm:$0xff] }
  0x18   :  { %v175_v40 = vpack.c.bf16 %v165_v34, %v164_v33  ;;  %v162_v42 = vcvt.s32.f32 %v146_v35  ;;  %v163_v44 = vcvt.s32.f32 %v147_v36  ;;  %v81_v45 = vunpack.c.3.s8 %v71_v32  ;;  %v236_v34 = vld [vmem:[%s388_s3] ss:$0 sm:$0xff] }
  0x19   :  { %115 = vmatpush.bf16.msra.mxu0 %v112_v24  ;;  %v144_v46 = vunpack.c.2.s8 %v135_v37  ;;  %v145_v47 = vunpack.c.3.s8 %v135_v37  ;;  %v78_v48 = vunpack.c.0.s8 %v71_v32  ;;  %v79_v49 = vunpack.c.1.s8 %v71_v32  ;;  %v68_v24 = vld [vmem:[#allocation2] sm:$0xff] }
  0x1a   :  { %179 = vmatpush.bf16.msra.mxu1 %v176_v25  ;;  %v110_v50 = vpack.c.bf16 %v99_v41, %v98_v39  ;;  %v96_v51 = vcvt.s32.f32 %v80_v43  ;;  %v142_v52 = vunpack.c.0.s8 %v135_v37  ;;  %v143_v53 = vunpack.c.1.s8 %v135_v37  ;;  %v132_v25 = vld [vmem:[#allocation2 + $0x8] sm:$0xff] }
  0x1b   :  { %v174_v55 = vpack.c.bf16 %v163_v44, %v162_v42  ;;  %v97_v56 = vcvt.s32.f32 %v81_v45  ;;  %v160_v57 = vcvt.s32.f32 %v144_v46  ;;  %v161_v58 = vcvt.s32.f32 %v145_v47 }
  0x1c   :  { %v94_v60 = vcvt.s32.f32 %v78_v48  ;;  %v95_v61 = vcvt.s32.f32 %v79_v49  ;;  %v76_v62 = vunpack.c.2.s8 %v70_v54  ;;  %v158_v63 = vcvt.s32.f32 %v142_v52 }
  0x1d   :  { %116 = vmatpush.bf16.msra.mxu0 %v111_v38  ;;  %v159_v0 = vcvt.s32.f32 %v143_v53  ;;  %v77_v1 = vunpack.c.3.s8 %v70_v54  ;;  %v109_v2 = vpack.c.bf16 %v97_v56, %v96_v51  ;;  %v173_v3 = vpack.c.bf16 %v161_v58, %v160_v57 }
  0x1e   :  { %180 = vmatpush.bf16.msra.mxu1 %v175_v40  ;;  %v140_v4 = vunpack.c.2.s8 %v134_v59  ;;  %v141_v5 = vunpack.c.3.s8 %v134_v59  ;;  %v108_v6 = vpack.c.bf16 %v95_v61, %v94_v60  ;;  %v92_v7 = vcvt.s32.f32 %v76_v62 }
  0x1f   :  { %v172_v8 = vpack.c.bf16 %v159_v0, %v158_v63  ;;  %v93_v9 = vcvt.s32.f32 %v77_v1  ;;  %v74_v10 = vunpack.c.0.s8 %v70_v54  ;;  %v75_v11 = vunpack.c.1.s8 %v70_v54 }
  0x20   :  { %v156_v12 = vcvt.s32.f32 %v140_v4  ;;  %v157_v13 = vcvt.s32.f32 %v141_v5  ;;  %v138_v14 = vunpack.c.0.s8 %v134_v59  ;;  %v139_v15 = vunpack.c.1.s8 %v134_v59 }
  0x21   :  { %117 = vmatpush.bf16.msra.mxu0 %v110_v50  ;;  %v107_v16 = vpack.c.bf16 %v93_v9, %v92_v7  ;;  %v90_v17 = vcvt.s32.f32 %v74_v10  ;;  %v91_v19 = vcvt.s32.f32 %v75_v11  ;;  %v69_v26 = vpack.c.bf16 %v68_v24, %v68_v24 }
  0x22   :  { %181 = vmatpush.bf16.msra.mxu1 %v174_v55  ;;  %v171_v18 = vpack.c.bf16 %v157_v13, %v156_v12  ;;  %v154_v20 = vcvt.s32.f32 %v138_v14  ;;  %v155_v21 = vcvt.s32.f32 %v139_v15  ;;  %v133_v27 = vpack.c.bf16 %v132_v25, %v132_v25 }
  0x23   :  { %v106_v22 = vpack.c.bf16 %v91_v19, %v90_v17 }
  0x24   :  { %v170_v23 = vpack.c.bf16 %v155_v21, %v154_v20 }
  0x25   :  { %118 = vmatpush.bf16.msra.mxu0 %v109_v2 }
  0x26   :  { %182 = vmatpush.bf16.msra.mxu1 %v173_v3 }
  0x29   :  { %119 = vmatpush.bf16.msra.mxu0 %v108_v6 }
  0x2a   :  { %183 = vmatpush.bf16.msra.mxu1 %v172_v8 }
  0x2d   :  { %120 = vmatpush.bf16.msra.mxu0 %v107_v16 }
  0x2e   :  { %184 = vmatpush.bf16.msra.mxu1 %v171_v18 }
  0x31   :  { %121 = vmatpush.bf16.msra.mxu0 %v106_v22 }
  0x32   :  { %185 = vmatpush.bf16.msra.mxu1 %v170_v23 }
  0x34   :  { %122 = vmatmul.bf16.vlgmr.msra.gmra.mxu0 %v69_v26 }
  0x35   :  { %186 = vmatmul.bf16.vlgmr.msra.gmra.mxu1 %v133_v27 }
  0xb1   :  { %v123_v30 = vpop.f32.mrf.mxu0 }
  0xb2   :  { %v187_v31 = vpop.f32.mrf.mxu1  ;;  %v130_v32 = vmul.f32 %v234_v28, %v123_v30 }
  0xb3   :  { %v195_v33 = vmul.f32 %v235_v29, %v187_v31 }
  0xb5   :  { %v196_v35 = vadd.f32 %v195_v33, %v130_v32 }
  0xb7   :  { %v206_v36 = vadd.f32 %v236_v34, %v196_v35 }
  0xb9   :  { %v125_v37 = vpop.f32.mrf.mxu0  ;;  %207 = vst [vmem:[#allocation8] sm:$0xff] %v206_v36 }
  0xba   :  { %v189_v38 = vpop.f32.mrf.mxu1  ;;  %218 = dma.vmem_to_hbm [thread:$0]  %s214_s6, 128, %s216_s9, [#allocation4]  }
  0xbb   :  { %337 = dma.done.wait [#allocation4], 128  }
  0xbc   :  { %338 = vsyncadd [#allocation4], 4294967168 }
  0xbd   :  { %223 = vsyncpa [#allocation3], 1 }
  0xbe   :  { %224 = vsyncpa [#allocation6], 1 }
  0xbf   :  { %225 = vsyncpa [#allocation4], 1 }

</bundles_post_ra>
